<compile_context>
chip_gen: v5e
topology: v5e:2x2
jax: 0.10.0
libtpu: 0.0.40
codegen_flags: <defaults>
</compile_context>

<pallas_src>
import functools

import jax
import jax.numpy as jnp
from jax.experimental import pallas as pl
from jax.experimental.pallas import tpu as pltpu


_LANE = 128     # last-dim alignment (lanes)
_SUBLANE = 8    # second-to-last-dim alignment (sublanes, f32)


def _round_up(n, m):
    return ((n + m - 1) // m) * m


def _fused_mlp_kernel(x_ref, *refs, num_layers):
    """o = L_{n-1}(relu(L_{n-2}(... relu(L_0(x)) ...))) -- intermediates stay in VMEM."""
    o_ref = refs[-1]
    h = x_ref[...]
    for i in range(num_layers):
        w_ref = refs[2 * i]        # (d_in[_pad], d_out_pad), already transposed, bf16
        b_ref = refs[2 * i + 1]    # (1, d_out_pad), f32
        # Cast activations to the weight dtype (no-op on layer 0) so the bf16
        # weights hit the native MXU input format; accumulate in f32.
        h = jnp.dot(h.astype(w_ref.dtype), w_ref[...],
                    preferred_element_type=jnp.float32)
        h = h + b_ref[...]
        if i < num_layers - 1:     # clamp(min=0) on all but the last layer
            h = jnp.maximum(h, 0.0)
    o_ref[...] = h.astype(o_ref.dtype)


def init_params(dims, key):
    """PyTorch-Linear-style init: U(-1/sqrt(fan_in), 1/sqrt(fan_in)); weight is [out, in]."""
    params = []
    for i in range(len(dims) - 1):
        fan_in, fan_out = dims[i], dims[i + 1]
        key, kw, kb = jax.random.split(key, 3)
        bound = 1.0 / jnp.sqrt(jnp.float32(fan_in))
        w = jax.random.uniform(kw, (fan_out, fan_in), jnp.float32, -bound, bound)
        b = jax.random.uniform(kb, (fan_out,), jnp.float32, -bound, bound)
        params.append((w, b))
    return params


def prepare_params(params, dtype=jnp.bfloat16):
    """One-time prep: transpose [out,in]->[in,out], zero-pad out-features to
    128-lane-aligned widths, cast weights to `dtype` (bf16 default = native MXU
    format on v5e/v6e/v7x), keep biases as f32 (1, d_out_pad) rows.

    Layer 0 keeps its true input dim (x is not feature-padded); deeper layers
    pad the input dim to match the previous layer's padded output.  Zero padding
    keeps the math exact: padded output columns stay 0 through bias+ReLU, and
    padded input rows only ever see zero activations.
    """
    prepared = []
    for idx, (w, b) in enumerate(params):
        d_out, d_in = w.shape
        d_out_p = _round_up(d_out, _LANE)
        d_in_p = d_in if idx == 0 else _round_up(d_in, _LANE)
        w_t = jnp.zeros((d_in_p, d_out_p), dtype).at[:d_in, :d_out].set(
            w.T.astype(dtype))
        b_row = jnp.zeros((1, d_out_p), jnp.float32).at[0, :d_out].set(
            b.astype(jnp.float32))
        prepared.append((w_t, b_row))
    return prepared


def _choose_batch_tiling(B, max_tile):
    """Sublane-pad the batch, pick a tile dividing it (avoid dead rows), and
    prefer >=2 grid steps for large batches so v7x's two TCs both get work."""
    b_pad = _round_up(B, _SUBLANE)
    if b_pad <= max_tile:
        tb = b_pad
    else:
        # Largest multiple-of-16 divisor of b_pad not exceeding max_tile
        # (bf16-friendly sublanes, zero padded rows).
        tb = 0
        for cand in range(16, max_tile + 1, 16):
            if b_pad % cand == 0:
                tb = cand
        if tb < 64:
            # No reasonable divisor: accept a ragged tail instead of tiny tiles.
            tb = max_tile
            b_pad = _round_up(B, tb)
    if b_pad == tb and tb >= 128 and tb % 32 == 0:
        tb //= 2   # at least 2 "parallel" steps -> both v7x TensorCores busy
    return tb, b_pad


def mlp_forward(x, prepared, *, out_features, max_batch_tile=512,
                single_buffer_weights=True):
    """Fused MLP forward: pad(batch)+cast -> single pallas_call -> slice real rows/cols."""
    B, d_in = x.shape
    n_layers = len(prepared)
    assert prepared[0][0].shape[0] == d_in
    w_dtype = prepared[0][0].dtype
    d_last_pad = prepared[-1][0].shape[1]

    tb, b_pad = _choose_batch_tiling(B, max_batch_tile)

    # Single fused pad(batch)+cast copy of x; features are NOT padded.
    x_pad = jnp.pad(x, ((0, b_pad - B), (0, 0))).astype(w_dtype)

    w_kwargs = {}
    if single_buffer_weights:
        # Weight/bias index_maps are constant across the batch grid -> they are
        # fetched once; single-buffer them so they don't cost 2x VMEM.
        w_kwargs["pipeline_mode"] = pl.Buffered(1)

    in_specs = [pl.BlockSpec((tb, d_in), lambda i: (i, 0))]
    flat_params = []
    for w_t, b_row in prepared:
        in_specs.append(pl.BlockSpec(w_t.shape, lambda i: (0, 0), **w_kwargs))
        in_specs.append(pl.BlockSpec(b_row.shape, lambda i: (0, 0), **w_kwargs))
        flat_params.extend((w_t, b_row))

    # Explicit VMEM budget: resident params (x buffer count), double-buffered
    # x/out tiles, f32 intermediates, plus headroom for compiler scratch.
    n_buf = 1 if single_buffer_weights else 2
    param_bytes = sum(a.size * a.dtype.itemsize for a in flat_params)
    x_tile_bytes = tb * d_in * jnp.dtype(w_dtype).itemsize
    o_tile_bytes = tb * d_last_pad * x.dtype.itemsize
    inter_bytes = sum(2 * tb * w.shape[1] * 4 for w, _ in prepared)
    footprint = n_buf * param_bytes + 2 * x_tile_bytes + 2 * o_tile_bytes + inter_bytes
    vmem_limit = int(min(max(footprint + 8 * 2**20, 32 * 2**20), 96 * 2**20))

    y_pad = pl.pallas_call(
        functools.partial(_fused_mlp_kernel, num_layers=n_layers),
        out_shape=jax.ShapeDtypeStruct((b_pad, d_last_pad), x.dtype),
        grid=(b_pad // tb,),
        in_specs=in_specs,
        out_specs=pl.BlockSpec((tb, d_last_pad), lambda i: (i, 0)),
        compiler_params=pltpu.CompilerParams(
            dimension_semantics=("parallel",),
            vmem_limit_bytes=vmem_limit),
    )(x_pad, *flat_params)

    return y_pad[:B, :out_features]


def mlp_reference(x, params):
    h = x
    n = len(params)
    for i, (w, b) in enumerate(params):
        h = h @ w.T + b
        if i < n - 1:
            h = jnp.maximum(h, 0.0)
    return h


if __name__ == "__main__":
    # args['dims'] must have length > 3 (per the module's assert)
    dims = [32, 64, 48, 16]
    batch = 2

    key = jax.random.PRNGKey(0)
    key, kx = jax.random.split(key)
    x = jax.random.normal(kx, (batch, dims[0]), jnp.float32)

    params = init_params(dims, key)            # PyTorch-layout [out, in] f32 weights
    prepared = prepare_params(params)          # one-time: transpose + pad + bf16 cast

    # Prefer single-buffered resident weights; fall back to default buffering if
    # this JAX version rejects pipeline_mode=Buffered(1).
    y = None
    last_err = None
    for single_buf in (True, False):
        try:
            fwd = jax.jit(functools.partial(
                mlp_forward, out_features=dims[-1],
                single_buffer_weights=single_buf))
            y = fwd(x, prepared)
            jax.block_until_ready(y)
            break
        except Exception as e:   # noqa: BLE001 - fallback path, re-raised below if both fail
            last_err = e
    if y is None:
        raise last_err

    y_ref = mlp_reference(x, params)
    assert y.shape == (batch, dims[-1])
    # bf16 weight/activation path vs f32 reference -> loosened tolerance.
    assert jnp.allclose(y, y_ref, atol=5e-2, rtol=5e-2), (
        float(jnp.max(jnp.abs(y - y_ref))))

    print("KERNEL_OK")
</pallas_src>

<mosaic_0001>
module attributes {stable_mosaic.version = 11 : i64} {
  func.func @_fused_mlp_kernel(%arg0: i32, %arg1: memref<8x32xbf16, #tpu.memory_space<vmem>>, %arg2: memref<32x128xbf16, #tpu.memory_space<vmem>>, %arg3: memref<1x128xf32, #tpu.memory_space<vmem>>, %arg4: memref<128x128xbf16, #tpu.memory_space<vmem>>, %arg5: memref<1x128xf32, #tpu.memory_space<vmem>>, %arg6: memref<128x128xbf16, #tpu.memory_space<vmem>>, %arg7: memref<1x128xf32, #tpu.memory_space<vmem>>, %arg8: memref<8x128xf32, #tpu.memory_space<vmem>>) attributes {dimension_semantics = [#tpu.dimension_semantics<parallel>], iteration_bounds = array<i64: 1>, scalar_prefetch = 0 : i64, scratch_operands = 0 : i64, tpu.core_type = #tpu.core_type<tc>, window_params = [{transform_indices = @transform_0, window_bounds = array<i64: 8, 32>}, {pipeline_mode = #tpu.pipeline_mode<synchronous>, transform_indices = @transform_1, window_bounds = array<i64: 32, 128>}, {pipeline_mode = #tpu.pipeline_mode<synchronous>, transform_indices = @transform_2, window_bounds = array<i64: 1, 128>}, {pipeline_mode = #tpu.pipeline_mode<synchronous>, transform_indices = @transform_3, window_bounds = array<i64: 128, 128>}, {pipeline_mode = #tpu.pipeline_mode<synchronous>, transform_indices = @transform_4, window_bounds = array<i64: 1, 128>}, {pipeline_mode = #tpu.pipeline_mode<synchronous>, transform_indices = @transform_5, window_bounds = array<i64: 128, 128>}, {pipeline_mode = #tpu.pipeline_mode<synchronous>, transform_indices = @transform_6, window_bounds = array<i64: 1, 128>}, {transform_indices = @transform_7, window_bounds = array<i64: 8, 128>}]} {
    %c0 = arith.constant 0 : index
    %c0_0 = arith.constant 0 : index
    %0 = vector.load %arg1[%c0, %c0_0] : memref<8x32xbf16, #tpu.memory_space<vmem>>, vector<8x32xbf16>
    %c0_1 = arith.constant 0 : index
    %c0_2 = arith.constant 0 : index
    %1 = vector.load %arg2[%c0_1, %c0_2] : memref<32x128xbf16, #tpu.memory_space<vmem>>, vector<32x128xbf16>
    %cst = arith.constant dense<0.000000e+00> : vector<8x128xf32>
    %2 = tpu.matmul %0, %1, %cst {dimension_numbers = #tpu.dot_dimension_numbers<[1], [0], [0], [1], [0, 0, 1, 1], [], []>} : vector<8x32xbf16>, vector<32x128xbf16>, vector<8x128xf32> -> vector<8x128xf32>
    %c0_3 = arith.constant 0 : index
    %c0_4 = arith.constant 0 : index
    %3 = vector.load %arg3[%c0_3, %c0_4] : memref<1x128xf32, #tpu.memory_space<vmem>>, vector<1x128xf32>
    %4 = vector.broadcast %3 : vector<1x128xf32> to vector<8x128xf32>
    %5 = arith.addf %2, %4 : vector<8x128xf32>
    %cst_5 = arith.constant 0.000000e+00 : f32
    %6 = vector.broadcast %cst_5 : f32 to vector<8x128xf32>
    %7 = arith.maximumf %5, %6 : vector<8x128xf32>
    %8 = arith.truncf %7 : vector<8x128xf32> to vector<8x128xbf16>
    %c0_6 = arith.constant 0 : index
    %c0_7 = arith.constant 0 : index
    %9 = vector.load %arg4[%c0_6, %c0_7] : memref<128x128xbf16, #tpu.memory_space<vmem>>, vector<128x128xbf16>
    %cst_8 = arith.constant dense<0.000000e+00> : vector<8x128xf32>
    %10 = tpu.matmul %8, %9, %cst_8 {dimension_numbers = #tpu.dot_dimension_numbers<[1], [0], [0], [1], [0, 0, 1, 1], [], []>} : vector<8x128xbf16>, vector<128x128xbf16>, vector<8x128xf32> -> vector<8x128xf32>
    %c0_9 = arith.constant 0 : index
    %c0_10 = arith.constant 0 : index
    %11 = vector.load %arg5[%c0_9, %c0_10] : memref<1x128xf32, #tpu.memory_space<vmem>>, vector<1x128xf32>
    %12 = vector.broadcast %11 : vector<1x128xf32> to vector<8x128xf32>
    %13 = arith.addf %10, %12 : vector<8x128xf32>
    %cst_11 = arith.constant 0.000000e+00 : f32
    %14 = vector.broadcast %cst_11 : f32 to vector<8x128xf32>
    %15 = arith.maximumf %13, %14 : vector<8x128xf32>
    %16 = arith.truncf %15 : vector<8x128xf32> to vector<8x128xbf16>
    %c0_12 = arith.constant 0 : index
    %c0_13 = arith.constant 0 : index
    %17 = vector.load %arg6[%c0_12, %c0_13] : memref<128x128xbf16, #tpu.memory_space<vmem>>, vector<128x128xbf16>
    %cst_14 = arith.constant dense<0.000000e+00> : vector<8x128xf32>
    %18 = tpu.matmul %16, %17, %cst_14 {dimension_numbers = #tpu.dot_dimension_numbers<[1], [0], [0], [1], [0, 0, 1, 1], [], []>} : vector<8x128xbf16>, vector<128x128xbf16>, vector<8x128xf32> -> vector<8x128xf32>
    %c0_15 = arith.constant 0 : index
    %c0_16 = arith.constant 0 : index
    %19 = vector.load %arg7[%c0_15, %c0_16] : memref<1x128xf32, #tpu.memory_space<vmem>>, vector<1x128xf32>
    %20 = vector.broadcast %19 : vector<1x128xf32> to vector<8x128xf32>
    %21 = arith.addf %18, %20 : vector<8x128xf32>
    %c0_17 = arith.constant 0 : index
    %c0_18 = arith.constant 0 : index
    %22 = vector.load %arg8[%c0_17, %c0_18] : memref<8x128xf32, #tpu.memory_space<vmem>>, vector<8x128xf32>
    tpu.vector_store %arg8[%c0_17, %c0_18], %21 {strides = array<i32>} : memref<8x128xf32, #tpu.memory_space<vmem>>, vector<8x128xf32>,
    return
  }
  func.func @transform_0(%arg0: i32) -> (i32, i32) {
    %c0_i32 = arith.constant 0 : i32
    %c0_i32_0 = arith.constant 0 : i32
    return %arg0, %c0_i32 : i32, i32
  }
  func.func @transform_1(%arg0: i32) -> (i32, i32) {
    %c0_i32 = arith.constant 0 : i32
    %c0_i32_0 = arith.constant 0 : i32
    %c0_i32_1 = arith.constant 0 : i32
    return %c0_i32, %c0_i32_0 : i32, i32
  }
  func.func @transform_2(%arg0: i32) -> (i32, i32) {
    %c0_i32 = arith.constant 0 : i32
    %c0_i32_0 = arith.constant 0 : i32
    %c0_i32_1 = arith.constant 0 : i32
    return %c0_i32, %c0_i32_0 : i32, i32
  }
  func.func @transform_3(%arg0: i32) -> (i32, i32) {
    %c0_i32 = arith.constant 0 : i32
    %c0_i32_0 = arith.constant 0 : i32
    %c0_i32_1 = arith.constant 0 : i32
    return %c0_i32, %c0_i32_0 : i32, i32
  }
  func.func @transform_4(%arg0: i32) -> (i32, i32) {
    %c0_i32 = arith.constant 0 : i32
    %c0_i32_0 = arith.constant 0 : i32
    %c0_i32_1 = arith.constant 0 : i32
    return %c0_i32, %c0_i32_0 : i32, i32
  }
  func.func @transform_5(%arg0: i32) -> (i32, i32) {
    %c0_i32 = arith.constant 0 : i32
    %c0_i32_0 = arith.constant 0 : i32
    %c0_i32_1 = arith.constant 0 : i32
    return %c0_i32, %c0_i32_0 : i32, i32
  }
  func.func @transform_6(%arg0: i32) -> (i32, i32) {
    %c0_i32 = arith.constant 0 : i32
    %c0_i32_0 = arith.constant 0 : i32
    %c0_i32_1 = arith.constant 0 : i32
    return %c0_i32, %c0_i32_0 : i32, i32
  }
  func.func @transform_7(%arg0: i32) -> (i32, i32) {
    %c0_i32 = arith.constant 0 : i32
    %c0_i32_0 = arith.constant 0 : i32
    return %arg0, %c0_i32 : i32, i32
  }
}

module attributes {stable_mosaic.version = 11 : i64} {
  func.func @_fused_mlp_kernel(%arg0: i32, %arg1: memref<8x32xbf16, #tpu.memory_space<vmem>>, %arg2: memref<32x128xbf16, #tpu.memory_space<vmem>>, %arg3: memref<1x128xf32, #tpu.memory_space<vmem>>, %arg4: memref<128x128xbf16, #tpu.memory_space<vmem>>, %arg5: memref<1x128xf32, #tpu.memory_space<vmem>>, %arg6: memref<128x128xbf16, #tpu.memory_space<vmem>>, %arg7: memref<1x128xf32, #tpu.memory_space<vmem>>, %arg8: memref<8x128xf32, #tpu.memory_space<vmem>>) attributes {dimension_semantics = [#tpu.dimension_semantics<parallel>], iteration_bounds = array<i64: 1>, scalar_prefetch = 0 : i64, scratch_operands = 0 : i64, tpu.core_type = #tpu.core_type<tc>, window_params = [{transform_indices = @transform_0, window_bounds = array<i64: 8, 32>}, {pipeline_mode = #tpu.pipeline_mode<synchronous>, transform_indices = @transform_1, window_bounds = array<i64: 32, 128>}, {pipeline_mode = #tpu.pipeline_mode<synchronous>, transform_indices = @transform_2, window_bounds = array<i64: 1, 128>}, {pipeline_mode = #tpu.pipeline_mode<synchronous>, transform_indices = @transform_3, window_bounds = array<i64: 128, 128>}, {pipeline_mode = #tpu.pipeline_mode<synchronous>, transform_indices = @transform_4, window_bounds = array<i64: 1, 128>}, {pipeline_mode = #tpu.pipeline_mode<synchronous>, transform_indices = @transform_5, window_bounds = array<i64: 128, 128>}, {pipeline_mode = #tpu.pipeline_mode<synchronous>, transform_indices = @transform_6, window_bounds = array<i64: 1, 128>}, {transform_indices = @transform_7, window_bounds = array<i64: 8, 128>}]} {
    %c0 = arith.constant 0 : index
    %c0_0 = arith.constant 0 : index
    %0 = vector.load %arg1[%c0, %c0_0] : memref<8x32xbf16, #tpu.memory_space<vmem>>, vector<8x32xbf16>
    %c0_1 = arith.constant 0 : index
    %c0_2 = arith.constant 0 : index
    %1 = vector.load %arg2[%c0_1, %c0_2] : memref<32x128xbf16, #tpu.memory_space<vmem>>, vector<32x128xbf16>
    %cst = arith.constant dense<0.000000e+00> : vector<8x128xf32>
    %2 = tpu.matmul %0, %1, %cst {dimension_numbers = #tpu.dot_dimension_numbers<[1], [0], [0], [1], [0, 0, 1, 1], [], []>} : vector<8x32xbf16>, vector<32x128xbf16>, vector<8x128xf32> -> vector<8x128xf32>
    %c0_3 = arith.constant 0 : index
    %c0_4 = arith.constant 0 : index
    %3 = vector.load %arg3[%c0_3, %c0_4] : memref<1x128xf32, #tpu.memory_space<vmem>>, vector<1x128xf32>
    %4 = vector.broadcast %3 : vector<1x128xf32> to vector<8x128xf32>
    %5 = arith.addf %2, %4 : vector<8x128xf32>
    %cst_5 = arith.constant 0.000000e+00 : f32
    %6 = vector.broadcast %cst_5 : f32 to vector<8x128xf32>
    %7 = arith.maximumf %5, %6 : vector<8x128xf32>
    %8 = arith.truncf %7 : vector<8x128xf32> to vector<8x128xbf16>
    %c0_6 = arith.constant 0 : index
    %c0_7 = arith.constant 0 : index
    %9 = vector.load %arg4[%c0_6, %c0_7] : memref<128x128xbf16, #tpu.memory_space<vmem>>, vector<128x128xbf16>
    %cst_8 = arith.constant dense<0.000000e+00> : vector<8x128xf32>
    %10 = tpu.matmul %8, %9, %cst_8 {dimension_numbers = #tpu.dot_dimension_numbers<[1], [0], [0], [1], [0, 0, 1, 1], [], []>} : vector<8x128xbf16>, vector<128x128xbf16>, vector<8x128xf32> -> vector<8x128xf32>
    %c0_9 = arith.constant 0 : index
    %c0_10 = arith.constant 0 : index
    %11 = vector.load %arg5[%c0_9, %c0_10] : memref<1x128xf32, #tpu.memory_space<vmem>>, vector<1x128xf32>
    %12 = vector.broadcast %11 : vector<1x128xf32> to vector<8x128xf32>
    %13 = arith.addf %10, %12 : vector<8x128xf32>
    %cst_11 = arith.constant 0.000000e+00 : f32
    %14 = vector.broadcast %cst_11 : f32 to vector<8x128xf32>
    %15 = arith.maximumf %13, %14 : vector<8x128xf32>
    %16 = arith.truncf %15 : vector<8x128xf32> to vector<8x128xbf16>
    %c0_12 = arith.constant 0 : index
    %c0_13 = arith.constant 0 : index
    %17 = vector.load %arg6[%c0_12, %c0_13] : memref<128x128xbf16, #tpu.memory_space<vmem>>, vector<128x128xbf16>
    %cst_14 = arith.constant dense<0.000000e+00> : vector<8x128xf32>
    %18 = tpu.matmul %16, %17, %cst_14 {dimension_numbers = #tpu.dot_dimension_numbers<[1], [0], [0], [1], [0, 0, 1, 1], [], []>} : vector<8x128xbf16>, vector<128x128xbf16>, vector<8x128xf32> -> vector<8x128xf32>
    %c0_15 = arith.constant 0 : index
    %c0_16 = arith.constant 0 : index
    %19 = vector.load %arg7[%c0_15, %c0_16] : memref<1x128xf32, #tpu.memory_space<vmem>>, vector<1x128xf32>
    %20 = vector.broadcast %19 : vector<1x128xf32> to vector<8x128xf32>
    %21 = arith.addf %18, %20 : vector<8x128xf32>
    %c0_17 = arith.constant 0 : index
    %c0_18 = arith.constant 0 : index
    %22 = vector.load %arg8[%c0_17, %c0_18] : memref<8x128xf32, #tpu.memory_space<vmem>>, vector<8x128xf32>
    tpu.vector_store %arg8[%c0_17, %c0_18], %21 {strides = array<i32>} : memref<8x128xf32, #tpu.memory_space<vmem>>, vector<8x128xf32>,
    return
  }
  func.func @transform_0(%arg0: i32) -> (i32, i32) {
    %c0_i32 = arith.constant 0 : i32
    %c0_i32_0 = arith.constant 0 : i32
    return %arg0, %c0_i32 : i32, i32
  }
  func.func @transform_1(%arg0: i32) -> (i32, i32) {
    %c0_i32 = arith.constant 0 : i32
    %c0_i32_0 = arith.constant 0 : i32
    %c0_i32_1 = arith.constant 0 : i32
    return %c0_i32, %c0_i32_0 : i32, i32
  }
  func.func @transform_2(%arg0: i32) -> (i32, i32) {
    %c0_i32 = arith.constant 0 : i32
    %c0_i32_0 = arith.constant 0 : i32
    %c0_i32_1 = arith.constant 0 : i32
    return %c0_i32, %c0_i32_0 : i32, i32
  }
  func.func @transform_3(%arg0: i32) -> (i32, i32) {
    %c0_i32 = arith.constant 0 : i32
    %c0_i32_0 = arith.constant 0 : i32
    %c0_i32_1 = arith.constant 0 : i32
    return %c0_i32, %c0_i32_0 : i32, i32
  }
  func.func @transform_4(%arg0: i32) -> (i32, i32) {
    %c0_i32 = arith.constant 0 : i32
    %c0_i32_0 = arith.constant 0 : i32
    %c0_i32_1 = arith.constant 0 : i32
    return %c0_i32, %c0_i32_0 : i32, i32
  }
  func.func @transform_5(%arg0: i32) -> (i32, i32) {
    %c0_i32 = arith.constant 0 : i32
    %c0_i32_0 = arith.constant 0 : i32
    %c0_i32_1 = arith.constant 0 : i32
    return %c0_i32, %c0_i32_0 : i32, i32
  }
  func.func @transform_6(%arg0: i32) -> (i32, i32) {
    %c0_i32 = arith.constant 0 : i32
    %c0_i32_0 = arith.constant 0 : i32
    %c0_i32_1 = arith.constant 0 : i32
    return %c0_i32, %c0_i32_0 : i32, i32
  }
  func.func @transform_7(%arg0: i32) -> (i32, i32) {
    %c0_i32 = arith.constant 0 : i32
    %c0_i32_0 = arith.constant 0 : i32
    return %arg0, %c0_i32 : i32, i32
  }
}

</mosaic_0001>

<bundles_post_ra>
// kernel: mlp_forward.1
= control target key start
LH: loop header
LB: loop body
LE: loop exit
PB: predicated region body
PF: predicated region fallthrough
CT: control target
= control target key end

     0   :  { %12 = vsyncpa [#allocation3], 0  ;;  %s529_s0 = inlined_call_operand.vmem [shape: bf16[8,32], index: 0, kind: input, shape index: {}]   ;;  %s530_s1 = inlined_call_operand.hbm [shape: bf16[32,128], index: 1, kind: input, shape index: {}]   ;;  %s531_s2 = inlined_call_operand.vmem [shape: f32[1,128], index: 2, kind: input, shape index: {}]   ;;  %s532_s3 = inlined_call_operand.hbm [shape: bf16[128,128], index: 3, kind: input, shape index: {}]   ;;  %s533_s4 = inlined_call_operand.vmem [shape: f32[1,128], index: 4, kind: input, shape index: {}]   ;;  %s534_s5 = inlined_call_operand.hbm [shape: bf16[128,128], index: 5, kind: input, shape index: {}]   ;;  %s535_s6 = inlined_call_operand.vmem [shape: f32[1,128], index: 6, kind: input, shape index: {}]   ;;  %s536_s7 = inlined_call_operand.vmem [shape: f32[8,128], index: 7, kind: output, shape index: {}]  }
   0x1   :  { %13 = vsyncpa [#allocation5], 0  ;;  %s35_s26 = sshll.u32 %s532_s3, 4  ;;  %s460_s27 = smov [#allocation4]   ;;  %s36_s26 = int_to_ptr.hbm [resolvable:$true] %s35_s26 }
   0x2   :  { %s37_s28 = sshll.u32 %s460_s27, 4  ;;  %s20_s8 = sshll.u32 %s530_s1, 4  ;;  %s38_s28 = int_to_ptr.vmem [resolvable:$true] %s37_s28  ;;  %s21_s8 = int_to_ptr.hbm [resolvable:$true] %s20_s8 }
   0x3   :  { %s461_s9 = smov 64   ;;  %s462_s10 = smov 4  }
   0x4   :  { %43 = dma.hbm_to_vmem [thread:$0]  %s36_s26, 1024, %s38_s28, [#allocation5], %s461_s9, %s461_s9, %s462_s10  }
   0x5   :  { %s463_s11 = smov [#allocation2]   ;;  %s50_s15 = sshll.u32 %s534_s5, 4  ;;  %s51_s15 = int_to_ptr.hbm [resolvable:$true] %s50_s15 }
   0x6   :  { %s22_s12 = sshll.u32 %s463_s11, 4  ;;  %s464_s3 = smov [#allocation6]   ;;  %s23_s12 = int_to_ptr.vmem [resolvable:$true] %s22_s12 }
   0x7   :  { %28 = dma.hbm_to_vmem [thread:$0]  %s21_s8, 256, %s23_s12, [#allocation3], %s461_s9, %s461_s9, %s462_s10  }
   0x8   :  { %s52_s16 = sshll.u32 %s464_s3, 4  ;;  %s53_s16 = int_to_ptr.vmem [resolvable:$true] %s52_s16 }
   0x9   :  { %58 = dma.hbm_to_vmem [thread:$0]  %s51_s15, 1024, %s53_s16, [#allocation5], %s461_s9, %s461_s9, %s462_s10  }
   0xa   :  { %456 = dma.done.wait [#allocation3], 256  }
   0xb   :  { %457 = vsyncadd [#allocation3], 4294967040 }
   0xc   :  { %458 = dma.done.wait [#allocation5], 2048  }
   0xd   :  { %459 = vsyncadd [#allocation5], 4294965248  ;;  %v359_v0 = vld [vmem:[#allocation2 + $0x8] sm:$0xff]  ;;  %v358_v2 = vld [vmem:[#allocation2] sm:$0xff]  ;;  %vm95_vm0 = vcmask 261120  }
   0xe   :  { %v367_v1 = vld [vmem:[#allocation4 + $0x38] sm:$0xff]  ;;  %105 = vmatpush.bf16.msra.mxu0 %v359_v0  ;;  %v366_v3 = vld [vmem:[#allocation4 + $0x30] sm:$0xff]  ;;  %v365_v5 = vld [vmem:[#allocation4 + $0x28] sm:$0xff] }
   0xf   :  { %182 = vmatpush.bf16.msra.mxu1 %v367_v1  ;;  %v74_v4 = vld [vmem:[%s529_s0] sm:$0xf]  ;;  %v364_v6 = vld [vmem:[#allocation4 + $0x20] sm:$0xff]  ;;  %v363_v7 = vld [vmem:[#allocation4 + $0x18] sm:$0xff] }
  0x10   :  { %v362_v8 = vld [vmem:[#allocation4 + $0x10] sm:$0xff]  ;;  %v361_v9 = vld [vmem:[#allocation4 + $0x8] sm:$0xff]  ;;  %v360_v10 = vld [vmem:[#allocation4] sm:$0xff] }
  0x11   :  { %v375_v11 = vld [vmem:[#allocation6 + $0x38] sm:$0xff]  ;;  %v374_v12 = vld [vmem:[#allocation6 + $0x30] sm:$0xff]  ;;  %v373_v13 = vld [vmem:[#allocation6 + $0x28] sm:$0xff] }
  0x12   :  { %106 = vmatpush.bf16.msra.mxu0 %v358_v2  ;;  %265 = vmatpush.bf16.msra.mxu2 %v375_v11  ;;  %v372_v14 = vld [vmem:[#allocation6 + $0x20] sm:$0xff]  ;;  %v371_v15 = vld [vmem:[#allocation6 + $0x18] sm:$0xff]  ;;  %v370_v16 = vld [vmem:[#allocation6 + $0x10] sm:$0xff] }
  0x13   :  { %183 = vmatpush.bf16.msra.mxu1 %v366_v3  ;;  %v381_v17 = vld [vmem:[%s531_s2] ss:$0 sm:$0xff]  ;;  %v369_v23 = vld [vmem:[#allocation6 + $0x8] sm:$0xff]  ;;  %v368_v24 = vld [vmem:[#allocation6] sm:$0xff] }
  0x14   :  { %v382_v25 = vld [vmem:[%s533_s4] ss:$0 sm:$0xff] }
  0x15   :  { %293 = vmatmul.msk.bf16.vlgmr.msra.gmra.mxu0 %vm95_vm0, %v74_v4  ;;  %v383_v31 = vld [vmem:[%s535_s6] ss:$0 sm:$0xff] }
  0x16   :  { %266 = vmatpush.bf16.msra.mxu2 %v374_v12 }
  0x17   :  { %184 = vmatpush.bf16.msra.mxu1 %v365_v5 }
  0x1a   :  { %267 = vmatpush.bf16.msra.mxu2 %v373_v13 }
  0x1b   :  { %185 = vmatpush.bf16.msra.mxu1 %v364_v6 }
  0x1e   :  { %268 = vmatpush.bf16.msra.mxu2 %v372_v14 }
  0x1f   :  { %186 = vmatpush.bf16.msra.mxu1 %v363_v7 }
  0x22   :  { %269 = vmatpush.bf16.msra.mxu2 %v371_v15 }
  0x23   :  { %187 = vmatpush.bf16.msra.mxu1 %v362_v8 }
  0x26   :  { %270 = vmatpush.bf16.msra.mxu2 %v370_v16 }
  0x27   :  { %188 = vmatpush.bf16.msra.mxu1 %v361_v9 }
  0x2a   :  { %271 = vmatpush.bf16.msra.mxu2 %v369_v23 }
  0x2b   :  { %189 = vmatpush.bf16.msra.mxu1 %v360_v10 }
  0x2e   :  { %272 = vmatpush.bf16.msra.mxu2 %v368_v24 }
  0x92   :  { %v108_v18 = vpop.f32.mrf.mxu0 }
  0x93   :  { %v109_v19 = vadd.f32 %v381_v17, %v108_v18 }
  0x95   :  { %v112_v20 = vmax.f32 %v109_v19, 0.0 }
  0x97   :  { %v113_v21 = vpack.c.bf16 %v112_v20, %v112_v20 }
  0x99   :  { %190 = vmatmul.bf16.vlgmr.msra.gmra.mxu1 %v113_v21 }
  0x9a   :  { %v110_v22 = vpop.f32.mrf.mxu0 }
 0x116   :  { %v191_v26 = vpop.f32.mrf.mxu1 }
 0x117   :  { %v192_v27 = vadd.f32 %v382_v25, %v191_v26 }
 0x119   :  { %v195_v28 = vmax.f32 %v192_v27, 0.0 }
 0x11b   :  { %v196_v29 = vpack.c.bf16 %v195_v28, %v195_v28 }
 0x11d   :  { %273 = vmatmul.bf16.vlgmr.msra.gmra.mxu2 %v196_v29 }
 0x11e   :  { %v193_v30 = vpop.f32.mrf.mxu1 }
 0x1a0   :  { %v274_v32 = vpop.f32.mrf.mxu2 }
 0x1a1   :  { %v275_v33 = vadd.f32 %v383_v31, %v274_v32 }
 0x1a3   :  { %278 = vst [vmem:[%s536_s7] sm:$0xff] %v275_v33 }
 0x1a8   :  { %v276_v34 = vpop.f32.mrf.mxu2 }
 0x1a9   :  { %283 = vsyncpa [#allocation3], 1 }
 0x1aa   :  { %284 = vsyncpa [#allocation5], 1 }

// kernel: mlp_forward.1
= control target key start
LH: loop header
LB: loop body
LE: loop exit
PB: predicated region body
PF: predicated region fallthrough
CT: control target
= control target key end

     0   :  { %12 = vsyncpa [#allocation3], 0  ;;  %s529_s0 = inlined_call_operand.vmem [shape: bf16[8,32], index: 0, kind: input, shape index: {}]   ;;  %s530_s1 = inlined_call_operand.hbm [shape: bf16[32,128], index: 1, kind: input, shape index: {}]   ;;  %s531_s2 = inlined_call_operand.vmem [shape: f32[1,128], index: 2, kind: input, shape index: {}]   ;;  %s532_s3 = inlined_call_operand.hbm [shape: bf16[128,128], index: 3, kind: input, shape index: {}]   ;;  %s533_s4 = inlined_call_operand.vmem [shape: f32[1,128], index: 4, kind: input, shape index: {}]   ;;  %s534_s5 = inlined_call_operand.hbm [shape: bf16[128,128], index: 5, kind: input, shape index: {}]   ;;  %s535_s6 = inlined_call_operand.vmem [shape: f32[1,128], index: 6, kind: input, shape index: {}]   ;;  %s536_s7 = inlined_call_operand.vmem [shape: f32[8,128], index: 7, kind: output, shape index: {}]  }
   0x1   :  { %13 = vsyncpa [#allocation5], 0  ;;  %s35_s26 = sshll.u32 %s532_s3, 4  ;;  %s460_s27 = smov [#allocation4]   ;;  %s36_s26 = int_to_ptr.hbm [resolvable:$true] %s35_s26 }
   0x2   :  { %s37_s28 = sshll.u32 %s460_s27, 4  ;;  %s20_s8 = sshll.u32 %s530_s1, 4  ;;  %s38_s28 = int_to_ptr.vmem [resolvable:$true] %s37_s28  ;;  %s21_s8 = int_to_ptr.hbm [resolvable:$true] %s20_s8 }
   0x3   :  { %s461_s9 = smov 64   ;;  %s462_s10 = smov 4  }
   0x4   :  { %43 = dma.hbm_to_vmem [thread:$0]  %s36_s26, 1024, %s38_s28, [#allocation5], %s461_s9, %s461_s9, %s462_s10  }
   0x5   :  { %s463_s11 = smov [#allocation2]   ;;  %s50_s15 = sshll.u32 %s534_s5, 4  ;;  %s51_s15 = int_to_ptr.hbm [resolvable:$true] %s50_s15 }
   0x6   :  { %s22_s12 = sshll.u32 %s463_s11, 4  ;;  %s464_s3 = smov [#allocation6]   ;;  %s23_s12 = int_to_ptr.vmem [resolvable:$true] %s22_s12 }
   0x7   :  { %28 = dma.hbm_to_vmem [thread:$0]  %s21_s8, 256, %s23_s12, [#allocation3], %s461_s9, %s461_s9, %s462_s10  }
   0x8   :  { %s52_s16 = sshll.u32 %s464_s3, 4  ;;  %s53_s16 = int_to_ptr.vmem [resolvable:$true] %s52_s16 }
   0x9   :  { %58 = dma.hbm_to_vmem [thread:$0]  %s51_s15, 1024, %s53_s16, [#allocation5], %s461_s9, %s461_s9, %s462_s10  }
   0xa   :  { %456 = dma.done.wait [#allocation3], 256  }
   0xb   :  { %457 = vsyncadd [#allocation3], 4294967040 }
   0xc   :  { %458 = dma.done.wait [#allocation5], 2048  }
   0xd   :  { %459 = vsyncadd [#allocation5], 4294965248  ;;  %v359_v0 = vld [vmem:[#allocation2 + $0x8] sm:$0xff]  ;;  %v358_v2 = vld [vmem:[#allocation2] sm:$0xff]  ;;  %vm95_vm0 = vcmask 261120  }
   0xe   :  { %v367_v1 = vld [vmem:[#allocation4 + $0x38] sm:$0xff]  ;;  %105 = vmatpush.bf16.msra.mxu0 %v359_v0  ;;  %v366_v3 = vld [vmem:[#allocation4 + $0x30] sm:$0xff]  ;;  %v365_v5 = vld [vmem:[#allocation4 + $0x28] sm:$0xff] }
   0xf   :  { %182 = vmatpush.bf16.msra.mxu1 %v367_v1  ;;  %v74_v4 = vld [vmem:[%s529_s0] sm:$0xf]  ;;  %v364_v6 = vld [vmem:[#allocation4 + $0x20] sm:$0xff]  ;;  %v363_v7 = vld [vmem:[#allocation4 + $0x18] sm:$0xff] }
  0x10   :  { %v362_v8 = vld [vmem:[#allocation4 + $0x10] sm:$0xff]  ;;  %v361_v9 = vld [vmem:[#allocation4 + $0x8] sm:$0xff]  ;;  %v360_v10 = vld [vmem:[#allocation4] sm:$0xff] }
  0x11   :  { %v375_v11 = vld [vmem:[#allocation6 + $0x38] sm:$0xff]  ;;  %v374_v12 = vld [vmem:[#allocation6 + $0x30] sm:$0xff]  ;;  %v373_v13 = vld [vmem:[#allocation6 + $0x28] sm:$0xff] }
  0x12   :  { %106 = vmatpush.bf16.msra.mxu0 %v358_v2  ;;  %265 = vmatpush.bf16.msra.mxu2 %v375_v11  ;;  %v372_v14 = vld [vmem:[#allocation6 + $0x20] sm:$0xff]  ;;  %v371_v15 = vld [vmem:[#allocation6 + $0x18] sm:$0xff]  ;;  %v370_v16 = vld [vmem:[#allocation6 + $0x10] sm:$0xff] }
  0x13   :  { %183 = vmatpush.bf16.msra.mxu1 %v366_v3  ;;  %v381_v17 = vld [vmem:[%s531_s2] ss:$0 sm:$0xff]  ;;  %v369_v23 = vld [vmem:[#allocation6 + $0x8] sm:$0xff]  ;;  %v368_v24 = vld [vmem:[#allocation6] sm:$0xff] }
  0x14   :  { %v382_v25 = vld [vmem:[%s533_s4] ss:$0 sm:$0xff] }
  0x15   :  { %293 = vmatmul.msk.bf16.vlgmr.msra.gmra.mxu0 %vm95_vm0, %v74_v4  ;;  %v383_v31 = vld [vmem:[%s535_s6] ss:$0 sm:$0xff] }
  0x16   :  { %266 = vmatpush.bf16.msra.mxu2 %v374_v12 }
  0x17   :  { %184 = vmatpush.bf16.msra.mxu1 %v365_v5 }
  0x1a   :  { %267 = vmatpush.bf16.msra.mxu2 %v373_v13 }
  0x1b   :  { %185 = vmatpush.bf16.msra.mxu1 %v364_v6 }
  0x1e   :  { %268 = vmatpush.bf16.msra.mxu2 %v372_v14 }
  0x1f   :  { %186 = vmatpush.bf16.msra.mxu1 %v363_v7 }
  0x22   :  { %269 = vmatpush.bf16.msra.mxu2 %v371_v15 }
  0x23   :  { %187 = vmatpush.bf16.msra.mxu1 %v362_v8 }
  0x26   :  { %270 = vmatpush.bf16.msra.mxu2 %v370_v16 }
  0x27   :  { %188 = vmatpush.bf16.msra.mxu1 %v361_v9 }
  0x2a   :  { %271 = vmatpush.bf16.msra.mxu2 %v369_v23 }
  0x2b   :  { %189 = vmatpush.bf16.msra.mxu1 %v360_v10 }
  0x2e   :  { %272 = vmatpush.bf16.msra.mxu2 %v368_v24 }
  0x92   :  { %v108_v18 = vpop.f32.mrf.mxu0 }
  0x93   :  { %v109_v19 = vadd.f32 %v381_v17, %v108_v18 }
  0x95   :  { %v112_v20 = vmax.f32 %v109_v19, 0.0 }
  0x97   :  { %v113_v21 = vpack.c.bf16 %v112_v20, %v112_v20 }
  0x99   :  { %190 = vmatmul.bf16.vlgmr.msra.gmra.mxu1 %v113_v21 }
  0x9a   :  { %v110_v22 = vpop.f32.mrf.mxu0 }
 0x116   :  { %v191_v26 = vpop.f32.mrf.mxu1 }
 0x117   :  { %v192_v27 = vadd.f32 %v382_v25, %v191_v26 }
 0x119   :  { %v195_v28 = vmax.f32 %v192_v27, 0.0 }
 0x11b   :  { %v196_v29 = vpack.c.bf16 %v195_v28, %v195_v28 }
 0x11d   :  { %273 = vmatmul.bf16.vlgmr.msra.gmra.mxu2 %v196_v29 }
 0x11e   :  { %v193_v30 = vpop.f32.mrf.mxu1 }
 0x1a0   :  { %v274_v32 = vpop.f32.mrf.mxu2 }
 0x1a1   :  { %v275_v33 = vadd.f32 %v383_v31, %v274_v32 }
 0x1a3   :  { %278 = vst [vmem:[%s536_s7] sm:$0xff] %v275_v33 }
 0x1a8   :  { %v276_v34 = vpop.f32.mrf.mxu2 }
 0x1a9   :  { %283 = vsyncpa [#allocation3], 1 }
 0x1aa   :  { %284 = vsyncpa [#allocation5], 1 }

</bundles_post_ra>
